<compile_context>
chip_gen: v6e
topology: v6e:2x2x1
jax: 0.10.0
libtpu: 0.0.40
codegen_flags: <defaults>
</compile_context>

<pallas_src>
import math
from typing import NamedTuple

import jax
import jax.numpy as jnp
from jax.experimental import pallas as pl
from jax.experimental.pallas import tpu as pltpu


# Past a few hundred groups the (TR, pack*G) compare chain + extra MXU passes of
# the one-hot path overtake the output-writeback bound; switch to a row gather.
GATHER_GROUP_THRESHOLD = 256


# ----------------------------------------------------------------------------
# Kernels
# ----------------------------------------------------------------------------
def _onehot_kernel(ids_ref, fused_ref, out_ref):
    # ids_ref:   (TR, PACK) int32  -- PACK group ids per packed output row, each
    #                                 pre-offset so id k lives in [k*G, (k+1)*G)
    # fused_ref: (GP, DP)   bf16   -- block-diagonal fused table (E @ W.T + b)
    # out_ref:   (TR, DP)          -- lane-dense packed output (DP multiple of 128)
    tr, npack = ids_ref.shape
    gp = fused_ref.shape[0]

    ids = ids_ref[...]                                           # (TR, PACK)
    col = jax.lax.broadcasted_iota(jnp.int32, (tr, gp), 1)       # (TR, GP)

    # One "multi-hot" row per packed output row: the PACK hits land in disjoint
    # column ranges of the block-diagonal table, so a single matmul emits PACK
    # independent embedding rows side by side (full, unmasked 128-lane stores).
    hit = col == ids[:, 0:1]
    for k in range(1, npack):                                    # unrolled at trace time
        hit = hit | (col == ids[:, k:k + 1])
    onehot = hit.astype(fused_ref.dtype)                         # exact 0/1 in bf16

    out_ref[...] = jnp.dot(onehot, fused_ref[...],
                           preferred_element_type=jnp.float32).astype(out_ref.dtype)


def _gather_row_kernel(ids_ref, row_ref, out_ref):
    # Large-G path: ids_ref is the scalar-prefetch ref (it drives the fused-table
    # index_map); row_ref is the gathered (1, DP) fused-table row.
    del ids_ref
    out_ref[...] = row_ref[...].astype(out_ref.dtype)


# ----------------------------------------------------------------------------
# Parameter folding (call once per parameter set, reuse across forwards)
# ----------------------------------------------------------------------------
class FusedGroupEmbedding(NamedTuple):
    table: jax.Array     # packed / column-padded fused table, (GP, DP)
    num_groups: int      # G
    dim: int             # D (true embedding_dim)
    pack: int            # batch elements packed per 128-lane output row
    use_gather: bool     # True -> scalar-prefetch row-gather kernel (large G)


def fold_group_embedding_params(table, w, b, *, param_dtype=jnp.bfloat16,
                                gather_threshold=GATHER_GROUP_THRESHOLD):
    """Fold the Linear into the embedding table and lay it out for the kernel.

    Exact fold: a one-hot row sums to 1, so onehot @ (E @ W.T + b) equals
    (onehot @ E) @ W.T + b.  This is the expensive wrapper work — hoist it out
    of the per-call path.
    """
    G, D = table.shape
    fused = (table.astype(jnp.float32) @ w.astype(jnp.float32).T
             + b.astype(jnp.float32)).astype(param_dtype)        # (G, D)

    use_gather = G > gather_threshold
    if not use_gather and D < 128 and 128 % D == 0:
        # Lane packing: PACK batch elements per 128-lane output row via a
        # block-diagonal table.
        pack = 128 // D
        fused_bd = jnp.zeros((pack * G, pack * D), dtype=param_dtype)
        for k in range(pack):
            fused_bd = fused_bd.at[k * G:(k + 1) * G, k * D:(k + 1) * D].set(fused)
        return FusedGroupEmbedding(fused_bd, G, D, pack, False)

    # Generic lane-dense layout: zero-pad columns to a multiple of 128 so every
    # store is a full unmasked vst; the wrapper slices the padding off.
    dp = max(128, pl.cdiv(D, 128) * 128)
    fused_p = jnp.pad(fused, ((0, 0), (0, dp - D)))
    return FusedGroupEmbedding(fused_p, G, D, 1, use_gather)


# ----------------------------------------------------------------------------
# Forward
# ----------------------------------------------------------------------------
def group_embedding_apply(group_id, fused: FusedGroupEmbedding, *,
                          block_batch=4096, out_dtype=jnp.float32):
    """out[i] = Linear(Embedding(group_id[i])) using the pre-folded table."""
    (B,) = group_id.shape
    G, D, pack = fused.num_groups, fused.dim, fused.pack
    GP, DP = fused.table.shape

    # nn.Embedding is undefined (PyTorch raises) for out-of-range ids; clamp.
    ids = jnp.clip(group_id.astype(jnp.int32), 0, G - 1)

    if fused.use_gather:
        # Large-G path: scalar-prefetched ids drive a data-dependent row gather.
        out = pl.pallas_call(
            _gather_row_kernel,
            out_shape=jax.ShapeDtypeStruct((B, DP), out_dtype),
            grid_spec=pltpu.PrefetchScalarGridSpec(
                num_scalar_prefetch=1,
                grid=(B,),
                in_specs=[pl.BlockSpec((1, DP), lambda i, ids_ref: (ids_ref[i], 0))],
                out_specs=pl.BlockSpec((1, DP), lambda i, ids_ref: (i, 0)),
            ),
            compiler_params=pltpu.CompilerParams(
                dimension_semantics=("arbitrary",)),
        )(ids, fused.table)
        return out[:, :D]

    # --- One-hot / block-diagonal path (small G) ------------------------------
    rows = pl.cdiv(B, pack)                                  # packed rows needed
    tile_rows = max(8, min(block_batch // pack, rows))       # big, VMEM-cheap tiles
    num_tiles = pl.cdiv(rows, tile_rows)
    tile_rows = pl.cdiv(pl.cdiv(rows, num_tiles), 8) * 8     # balanced, sublane-aligned
    r_pad = num_tiles * tile_rows
    b_pad = r_pad * pack

    ids = jnp.pad(ids, (0, b_pad - B))                       # padded rows discarded below
    ids_off = ids.reshape(r_pad, pack) + \
        (jnp.arange(pack, dtype=jnp.int32) * G)[None, :]     # offsets into block-diag

    out_packed = pl.pallas_call(
        _onehot_kernel,
        out_shape=jax.ShapeDtypeStruct((r_pad, DP), out_dtype),
        grid_spec=pltpu.PrefetchScalarGridSpec(
            num_scalar_prefetch=0,
            grid=(num_tiles,),
            in_specs=[
                # ids tile: one small DMA per batch tile
                pl.BlockSpec((tile_rows, pack), lambda i: (i, 0)),
                # fused table: constant block index -> fetched once, stays resident
                # (single-buffering it via pl.Buffered(1) is a possible micro-win)
                pl.BlockSpec((GP, DP), lambda i: (0, 0)),
            ],
            out_specs=pl.BlockSpec((tile_rows, DP), lambda i: (i, 0)),
        ),
        compiler_params=pltpu.CompilerParams(
            # TODO(synk): if xprof on v7x shows one idle TensorCore, switch this
            # axis to pltpu.CORE_PARALLEL; v5e/v6e are single-TC and unaffected.
            dimension_semantics=("parallel",),
        ),
    )(ids_off, fused.table)

    if pack > 1:
        # (r_pad, pack*D) row-major == (r_pad*pack, D) row-major: free reshape.
        return out_packed.reshape(r_pad * pack, D)[:B]
    return out_packed[:B, :D]


def group_embedding(group_id, table, w, b, *, param_dtype=jnp.bfloat16,
                    gather_threshold=GATHER_GROUP_THRESHOLD, **apply_kwargs):
    """One-shot convenience path (re-folds the parameters every call).

    For repeated forwards, call fold_group_embedding_params() once and then
    group_embedding_apply() per step.
    """
    fused = fold_group_embedding_params(table, w, b, param_dtype=param_dtype,
                                        gather_threshold=gather_threshold)
    return group_embedding_apply(group_id, fused, **apply_kwargs)


# ----------------------------------------------------------------------------
# Demo / correctness check
# ----------------------------------------------------------------------------
if __name__ == "__main__":
    # Small shapes consistent with the module: num_groups=16, embedding_dim=32,
    # a batch of 16 group ids.
    G, D, B = 16, 32, 16

    key = jax.random.PRNGKey(0)
    k_table, k_w, k_b, k_ids = jax.random.split(key, 4)

    # nn.Embedding default init: N(0, 1)
    table = jax.random.normal(k_table, (G, D), dtype=jnp.float32)
    # nn.Linear default init: U(-1/sqrt(fan_in), 1/sqrt(fan_in))
    bound = 1.0 / math.sqrt(D)
    w = jax.random.uniform(k_w, (D, D), minval=-bound, maxval=bound, dtype=jnp.float32)
    b = jax.random.uniform(k_b, (D,), minval=-bound, maxval=bound, dtype=jnp.float32)

    group_id = jax.random.randint(k_ids, (B,), 0, G, dtype=jnp.int32)

    # Fold the Linear into the table ONCE (hoisted out of the forward path).
    fused = fold_group_embedding_params(table, w, b)

    out = jax.block_until_ready(group_embedding_apply(group_id, fused))
    assert out.shape == (B, D)

    # Reference 1: gather from the bf16-rounded fused table — exactly what the
    # kernel computes (one-hot matmul over exact bf16 0/1, f32 accumulation).
    fused_ref = (table @ w.T + b).astype(jnp.bfloat16).astype(jnp.float32)
    assert jnp.allclose(out, fused_ref[group_id], atol=1e-6, rtol=0)

    # Reference 2: full-precision PyTorch-style forward; tolerance covers the
    # bf16 rounding of the fused parameters.
    full_ref = table[group_id] @ w.T + b
    assert jnp.allclose(out, full_ref, atol=2e-2, rtol=2e-2)

    print("KERNEL_OK")
</pallas_src>

<mosaic_0001>
module attributes {stable_mosaic.version = 11 : i64} {
  func.func @_onehot_kernel(%arg0: i32, %arg1: memref<8x4xi32, #tpu.memory_space<vmem>>, %arg2: memref<64x128xbf16, #tpu.memory_space<vmem>>, %arg3: memref<8x128xf32, #tpu.memory_space<vmem>>) attributes {dimension_semantics = [#tpu.dimension_semantics<parallel>], iteration_bounds = array<i64: 1>, scalar_prefetch = 0 : i64, scratch_operands = 0 : i64, tpu.core_type = #tpu.core_type<tc>, window_params = [{transform_indices = @transform_0, window_bounds = array<i64: 8, 4>}, {pipeline_mode = #tpu.pipeline_mode<synchronous>, transform_indices = @transform_1, window_bounds = array<i64: 64, 128>}, {transform_indices = @transform_2, window_bounds = array<i64: 8, 128>}]} {
    %c0 = arith.constant 0 : index
    %c0_0 = arith.constant 0 : index
    %0 = vector.load %arg1[%c0, %c0_0] : memref<8x4xi32, #tpu.memory_space<vmem>>, vector<8x4xi32>
    %1 = tpu.iota {dimensions = array<i32: 1>} : vector<8x64xi32>
    %2 = vector.extract_strided_slice %0 {offsets = [0, 0], sizes = [8, 1], strides = [1, 1]} : vector<8x4xi32> to vector<8x1xi32>
    %3 = vector.broadcast %2 : vector<8x1xi32> to vector<8x64xi32>
    %4 = arith.cmpi eq, %1, %3 : vector<8x64xi32>
    %5 = vector.extract_strided_slice %0 {offsets = [0, 1], sizes = [8, 1], strides = [1, 1]} : vector<8x4xi32> to vector<8x1xi32>
    %6 = vector.broadcast %5 : vector<8x1xi32> to vector<8x64xi32>
    %7 = arith.cmpi eq, %1, %6 : vector<8x64xi32>
    %8 = arith.ori %4, %7 : vector<8x64xi1>
    %9 = vector.extract_strided_slice %0 {offsets = [0, 2], sizes = [8, 1], strides = [1, 1]} : vector<8x4xi32> to vector<8x1xi32>
    %10 = vector.broadcast %9 : vector<8x1xi32> to vector<8x64xi32>
    %11 = arith.cmpi eq, %1, %10 : vector<8x64xi32>
    %12 = arith.ori %8, %11 : vector<8x64xi1>
    %13 = vector.extract_strided_slice %0 {offsets = [0, 3], sizes = [8, 1], strides = [1, 1]} : vector<8x4xi32> to vector<8x1xi32>
    %14 = vector.broadcast %13 : vector<8x1xi32> to vector<8x64xi32>
    %15 = arith.cmpi eq, %1, %14 : vector<8x64xi32>
    %16 = arith.ori %12, %15 : vector<8x64xi1>
    %17 = arith.extui %16 : vector<8x64xi1> to vector<8x64xi32>
    %18 = arith.sitofp %17 : vector<8x64xi32> to vector<8x64xf32>
    %19 = arith.truncf %18 : vector<8x64xf32> to vector<8x64xbf16>
    %c0_1 = arith.constant 0 : index
    %c0_2 = arith.constant 0 : index
    %20 = vector.load %arg2[%c0_1, %c0_2] : memref<64x128xbf16, #tpu.memory_space<vmem>>, vector<64x128xbf16>
    %cst = arith.constant dense<0.000000e+00> : vector<8x128xf32>
    %21 = tpu.matmul %19, %20, %cst {dimension_numbers = #tpu.dot_dimension_numbers<[1], [0], [0], [1], [0, 0, 1, 1], [], []>} : vector<8x64xbf16>, vector<64x128xbf16>, vector<8x128xf32> -> vector<8x128xf32>
    %c0_3 = arith.constant 0 : index
    %c0_4 = arith.constant 0 : index
    %22 = vector.load %arg3[%c0_3, %c0_4] : memref<8x128xf32, #tpu.memory_space<vmem>>, vector<8x128xf32>
    tpu.vector_store %arg3[%c0_3, %c0_4], %21 {strides = array<i32>} : memref<8x128xf32, #tpu.memory_space<vmem>>, vector<8x128xf32>,
    return
  }
  func.func @transform_0(%arg0: i32) -> (i32, i32) {
    %c0_i32 = arith.constant 0 : i32
    %c0_i32_0 = arith.constant 0 : i32
    return %arg0, %c0_i32 : i32, i32
  }
  func.func @transform_1(%arg0: i32) -> (i32, i32) {
    %c0_i32 = arith.constant 0 : i32
    %c0_i32_0 = arith.constant 0 : i32
    %c0_i32_1 = arith.constant 0 : i32
    return %c0_i32, %c0_i32_0 : i32, i32
  }
  func.func @transform_2(%arg0: i32) -> (i32, i32) {
    %c0_i32 = arith.constant 0 : i32
    %c0_i32_0 = arith.constant 0 : i32
    return %arg0, %c0_i32 : i32, i32
  }
}

</mosaic_0001>

<bundles_post_ra>
// kernel: tpu_custom_call.1
= control target key start
LH: loop header
LB: loop body
LE: loop exit
PB: predicated region body
PF: predicated region fallthrough
CT: control target
= control target key end

     0   :  { %7 = vsyncpa [#allocation3], 0  ;;  %s264_s0 = inlined_call_operand.vmem [shape: s32[8,4], index: 0, kind: input, shape index: {}]   ;;  %s265_s1 = inlined_call_operand.hbm [shape: bf16[64,128], index: 1, kind: input, shape index: {}]   ;;  %s266_s2 = inlined_call_operand.hbm [shape: f32[8,128], index: 2, kind: output, shape index: {}]  }
   0x1   :  { %8 = vsyncpa [#allocation4], 0  ;;  %s230_s9 = smov [#allocation2]  }
   0x2   :  { %s16_s10 = sshll.u32 %s230_s9, 4  ;;  %s17_s10 = int_to_ptr.vmem [resolvable:$true] %s16_s10 }
   0x3   :  { %s194_s11 = scalar_lea.vmem %s17_s10, 512  ;;  %p199_p1 = scmp.lt.s32.totalorder %s17_s10, %s17_s10 }
   0x4   :  { %p195_p0 = scmp.ne.s32.totalorder %s17_s10, %s194_s11  ;;  %p200_p2 = scmp.lt.s32.totalorder %s194_s11, %s194_s11 }
   0x6   :  { %p201_p3 = por %p200_p2, %p199_p1 }
   0x8   :  { %p202_p4 = pnand %p201_p3, %p195_p0 }
   0xa   :  { %205 = shalt.err (!%p202_p4)
}
   0xb   :  { %s231_s12 = smov 64   ;;  %s232_s13 = smov 4  }
   0xc   :  { %22 = dma.hbm_to_vmem [thread:$0]  %s265_s1, 512, %s17_s10, [#allocation3], %s231_s12, %s231_s12, %s232_s13  }
   0xd   :  { %226 = dma.done.wait [#allocation3], 512  }
   0xe   :  { %227 = vsyncadd [#allocation3], 4294966784  ;;  %v233_v0 = vmov 0   ;;  %v234_v1 = vmov 2   ;;  %v235_v2 = vmov 0.0   ;;  %v27_v3 = vld [vmem:[%s264_s0] sm:$0xff]  ;;  %v28_v10 = vlaneseq }
   0xf   :  { %177 = vset.pattern.permute.xlu0 %v233_v0  ;;  %179 = vset.pattern.permute.xlu1 %v234_v1  ;;  %v182_v4 = vld [vmem:[#allocation2 + $0x18] sm:$0xff]   ;;  %v183_v5 = vld [vmem:[#allocation2 + $0x10] sm:$0xff]   ;;  %v236_v6 = vmov 1   ;;  %v237_v7 = vmov 3   ;;  %v184_v8 = vld [vmem:[#allocation2 + $0x8] sm:$0xff]   ;;  %vm238_vm0 = vmmov 0  }
  0x10   :  { %155 = vmatprep.subr.bf16.mxu0 %v235_v2  ;;  %31 = vperm.xlu0 %177, %v27_v3   ;;  %v185_v9 = vld [vmem:[#allocation2] sm:$0xff]   ;;  %v29_v13 = vand.u32 127, %v28_v10  ;;  %vm84_vm8 = vcmask 523264   ;;  %s239_s0 = smov [#allocation5]  }
  0x11   :  { %40 = vperm.xlu1 %179, %v27_v3   ;;  %156 = vmatpush3.bf16.msra.mxu0 %v182_v4  ;;  %s135_s1 = sshll.u32 %s239_s0, 4  ;;  %s136_s1 = int_to_ptr.vmem [resolvable:$true] %s135_s1 }
  0x12   :  { %157 = vmatprep.subr.bf16.mxu0 %v235_v2  ;;  %163 = vmatprep.mubr.msk.bf16.mxu0 %vm238_vm0, %v235_v2  ;;  %s206_s18 = scalar_lea.vmem %s136_s1, 128  ;;  %p211_p6 = scmp.lt.s32.totalorder %s136_s1, %s136_s1 }
  0x13   :  { %p207_p5 = scmp.ne.s32.totalorder %s136_s1, %s206_s18  ;;  %p212_p7 = scmp.lt.s32.totalorder %s206_s18, %s206_s18 }
  0x14   :  { %178 = vset.pattern.permute.xlu0 %v236_v6 }
  0x15   :  { %180 = vset.pattern.permute.xlu1 %v237_v7  ;;  %35 = vperm.xlu0 %178, %v27_v3   ;;  %p213_p8 = por %p212_p7, %p211_p6 }
  0x16   :  { %45 = vperm.xlu1 %180, %v27_v3   ;;  %158 = vmatpush3.bf16.msra.mxu0 %v183_v5 }
  0x17   :  { %159 = vmatprep.subr.bf16.mxu0 %v235_v2  ;;  %p214_p9 = pnand %p213_p8, %p207_p5 }
  0x19   :  { %181 = vset.pattern.permute.xlu0 %v237_v7 }
  0x1a   :  { %160 = vmatpush3.bf16.msra.mxu0 %v184_v8 }
  0x1b   :  { %161 = vmatprep.subr.bf16.mxu0 %v235_v2 }
  0x1e   :  { %162 = vmatpush3.bf16.msra.mxu0 %v185_v9 }
  0x8b   :  { %v32_v11 = vpop.permute.xlu0 %31 }
  0x8c   :  { %v41_v12 = vpop.permute.xlu1 %40  ;;  %vm33_vm1 = vcmp.eq.s32.totalorder %v29_v13, %v32_v11 }
  0x8d   :  { %vm42_vm4 = vcmp.eq.s32.totalorder %v29_v13, %v41_v12 }
  0x90   :  { %v36_v14 = vpop.permute.xlu0 %35 }
  0x91   :  { %v46_v15 = vpop.permute.xlu1 %45  ;;  %vm37_vm2 = vcmp.eq.s32.totalorder %v29_v13, %v36_v14 }
  0x92   :  { %vm47_vm3 = vcmp.eq.s32.totalorder %v29_v13, %v46_v15  ;;  %vm38_vm5 = vmor %vm33_vm1, %vm37_vm2 }
  0x93   :  { %vm43_vm6 = vmor %vm38_vm5, %vm42_vm4 }
  0x94   :  { %vm48_vm7 = vmor %vm43_vm6, %vm47_vm3 }
  0x95   :  { %v144_v16 = vsel %vm48_vm7, 1.0, %v235_v2 }
  0x96   :  { %v51_v17 = vpack.c.bf16 %v144_v16, %v144_v16 }
  0x98   :  { %164 = vmatmul.mubr.msk.bf16.vlgmr.msra.gmra.mxu0 %vm84_vm8, %v51_v17 }
 0x158   :  { %v122_v18 = vpop.f32.mrf.mxu0 }
 0x159   :  { %128 = vst [vmem:[#allocation5] sm:$0xff] %v122_v18 }
 0x15a   :  { %v165_v19 = vpop.f32.mrf.mxu0 }
 0x15b   :  { %217 = shalt.err (!%p214_p9)
}
 0x15c   :  { %138 = dma.vmem_to_hbm [thread:$0]  %s136_s1, 128, %s266_s2, [#allocation4]   ;;  %v125_v20 = vpop.f32.mrf.mxu0 }
 0x15e   :  { %v166_v21 = vpop.f32.mrf.mxu0 }
 0x15f   :  { %228 = dma.done.wait [#allocation4], 128  }
 0x160   :  { %229 = vsyncadd [#allocation4], 4294967168 }
 0x161   :  { %142 = vsyncpa [#allocation3], 1 }
 0x162   :  { %143 = vsyncpa [#allocation4], 1 }

</bundles_post_ra>
